<compile_context>
chip_gen: v5e
topology: v5e:2x2
jax: 0.10.0
libtpu: 0.0.40
codegen_flags: <defaults>
</compile_context>

<pallas_src>
import functools
import math

import jax
import jax.numpy as jnp
from jax import lax
from jax.experimental import pallas as pl
from jax.experimental.pallas import tpu as pltpu


# ----------------------------- tiled linear ---------------------------------

def _pick_tile(dim, target, align):
    """Largest `align`-multiple tile <= target that divides dim, else full dim."""
    if dim <= target:
        return dim
    t = (target // align) * align
    while t >= align:
        if dim % t == 0:
            return t
        t -= align
    return dim


def _linear_nt_kernel(x_ref, wt_ref, b_ref, o_ref, acc_ref, *, compute_dtype):
    # y = x @ W_t + b, accumulated over the k grid axis in a VMEM f32 scratch.
    @pl.when(pl.program_id(2) == 0)
    def _():
        acc_ref[...] = jnp.zeros_like(acc_ref)

    acc_ref[...] += jnp.dot(
        x_ref[...].astype(compute_dtype),
        wt_ref[...].astype(compute_dtype),
        preferred_element_type=jnp.float32,
    )

    @pl.when(pl.program_id(2) == pl.num_programs(2) - 1)
    def _():
        o_ref[...] = (acc_ref[...] + b_ref[...]).astype(o_ref.dtype)


def linear_nt(x, w_t, b, *, compute_dtype=jnp.float32, out_dtype=jnp.float32,
              tm=256, tn=512, tk=512):
    """x: (M, K), w_t: (K, N) (pre-transposed), b: (N,) -> (M, N) in out_dtype."""
    M, K = x.shape
    K2, N = w_t.shape
    assert K == K2
    tm = _pick_tile(M, tm, 8)
    tn = _pick_tile(N, tn, 128)
    tk = _pick_tile(K, tk, 128)
    grid = (M // tm, N // tn, K // tk)

    in_b = jnp.dtype(x.dtype).itemsize
    w_b = jnp.dtype(w_t.dtype).itemsize
    out_b = jnp.dtype(out_dtype).itemsize
    est = (2 * (tm * tk * in_b + tk * tn * w_b) + 2 * tn * 4
           + 2 * tm * tn * out_b + tm * tn * 4)
    assert est < (48 << 20), "linear_nt tile working set exceeds VMEM budget"
    vmem_limit = int(min(max(2 * est, 24 << 20), 48 << 20))

    kern = functools.partial(_linear_nt_kernel, compute_dtype=compute_dtype)
    return pl.pallas_call(
        kern,
        out_shape=jax.ShapeDtypeStruct((M, N), out_dtype),
        grid=grid,
        in_specs=[
            pl.BlockSpec((tm, tk), lambda i, j, k: (i, k)),
            pl.BlockSpec((tk, tn), lambda i, j, k: (k, j)),
            pl.BlockSpec((1, tn), lambda i, j, k: (0, j)),
        ],
        out_specs=pl.BlockSpec((tm, tn), lambda i, j, k: (i, j)),
        scratch_shapes=[pltpu.VMEM((tm, tn), jnp.float32)],
        compiler_params=pltpu.CompilerParams(
            dimension_semantics=("parallel", "parallel", "arbitrary"),
            vmem_limit_bytes=vmem_limit),
    )(x, w_t, b.reshape(1, N))


# ------------------- fused RoPE + attention + out_proj ----------------------

def _rope_attn_outproj_kernel(q_ref, k_ref, v_ref, cos_q_ref, sin_q_ref,
                              cos_k_ref, sin_k_ref, wot_ref, bo_ref, o_ref,
                              attn_ref, *, num_heads, head_dim, compute_dtype):
    D = head_dim
    half = D // 2

    # Hoisted table loads (full-D lane width, f32) -- reused by every head.
    cq = cos_q_ref[...]          # (tq, D)
    sq = sin_q_ref[...]          # (tq, D)  sign-folded sin
    ck = cos_k_ref[...]          # (T,  D)
    sk = sin_k_ref[...]          # (T,  D)  sign-folded sin

    qf = q_ref[...].astype(jnp.float32)      # (tq, E), scaling folded into Wq/bq
    kf = k_ref[...].astype(jnp.float32)      # (T,  E)
    vf = v_ref[...].astype(compute_dtype)    # (T,  E)

    dn = (((1,), (1,)), ((), ()))            # contract dim 1 of both: q @ k^T

    # Heads are static column blocks; each iteration's state is local (PV goes
    # straight into the VMEM slab), so nothing is carried across the unroll.
    # TODO(synk): for very large num_heads, move heads onto a grid axis.
    for h in range(num_heads):
        lo = h * D
        qh = qf[:, lo:lo + D]
        kh = kf[:, lo:lo + D]

        # rotate_half(x) == roll(x, D/2) * [-1,..,-1,+1,..,+1]; the sign is
        # pre-folded into the sin table, and a roll by exactly D/2 is
        # direction-independent -> one XLU roll + two VPU FMAs per operand.
        q_rot = (qh * cq + pltpu.roll(qh, shift=half, axis=1) * sq).astype(compute_dtype)
        k_rot = (kh * ck + pltpu.roll(kh, shift=half, axis=1) * sk).astype(compute_dtype)

        # Single full-D contraction for the scores (no .T, no half-dots).
        s = lax.dot_general(q_rot, k_rot, dn,
                            preferred_element_type=jnp.float32)      # (tq, T)
        s = s - jnp.max(s, axis=-1, keepdims=True)
        e = jnp.exp(s)
        p = e / jnp.sum(e, axis=-1, keepdims=True)                    # exact softmax

        pv = jnp.dot(p.astype(compute_dtype), vf[:, lo:lo + D],
                     preferred_element_type=jnp.float32)              # (tq, D)
        attn_ref[:, lo:lo + D] = pv.astype(attn_ref.dtype)

    # One full-E-contraction out_proj matmul + bias; lane-dense (tq, E) store.
    o_ref[...] = (jnp.dot(attn_ref[...], wot_ref[...],
                          preferred_element_type=jnp.float32)
                  + bo_ref[...]).astype(o_ref.dtype)


def _attn_vmem_estimate(tq, T, E, D, qkv_bytes, w_bytes, acc_bytes):
    inp = 2 * (tq * E + 2 * T * E) * qkv_bytes     # q tile + k + v, double-buffered
    tables = 2 * 2 * (tq * D + T * D) * 4          # cos/sin (q tile + full T)
    weights = 2 * (E * E * w_bytes + E * 4)        # Wo^T + bias, double-buffered
    out = 2 * tq * E * 4
    scratch = tq * E * acc_bytes
    tmp = 8 * tq * max(T, E) * 4                   # scores / exp / RoPE temporaries
    return inp + tables + weights + out + scratch + tmp


def rope_attention_outproj(qkv, cos, sin_signed, wo_t, bo, *, num_heads,
                           compute_dtype=jnp.float32, vmem_budget=40 << 20):
    """qkv: (B, T, 3E); cos/sin_signed: (T, D); wo_t: (E, E); bo: (E,) -> (B, T, E)."""
    B, T, E3 = qkv.shape
    E = E3 // 3
    D = E // num_heads

    est = functools.partial(
        _attn_vmem_estimate, T=T, E=E, D=D,
        qkv_bytes=jnp.dtype(qkv.dtype).itemsize,
        w_bytes=jnp.dtype(wo_t.dtype).itemsize,
        acc_bytes=jnp.dtype(compute_dtype).itemsize)

    # Query tile: as large as possible within the (v7x-safe) VMEM budget.
    if T <= 512 and est(T) <= vmem_budget:
        tq = T
    else:
        tq = None
        for cand in (512, 256, 128, 64, 32, 16, 8):
            if T % cand == 0 and est(cand) <= vmem_budget:
                tq = cand
                break
        if tq is None:
            tq = T
    assert T % tq == 0
    n_qt = T // tq
    vmem_limit = int(min(max(int(1.5 * est(tq)) + (2 << 20), 24 << 20), 48 << 20))

    kern = functools.partial(
        _rope_attn_outproj_kernel, num_heads=num_heads, head_dim=D,
        compute_dtype=compute_dtype)

    return pl.pallas_call(
        kern,
        out_shape=jax.ShapeDtypeStruct((B, T, E), jnp.float32),
        grid=(B, n_qt),
        in_specs=[
            # qkv is passed three times with different column-block windows
            # (q tile / k full / v full) -- no wrapper-side slices or copies.
            pl.BlockSpec((None, tq, E), lambda b, i: (b, i, 0)),   # q tile
            pl.BlockSpec((None, T, E), lambda b, i: (b, 0, 1)),    # k (full T)
            pl.BlockSpec((None, T, E), lambda b, i: (b, 0, 2)),    # v (full T)
            pl.BlockSpec((tq, D), lambda b, i: (i, 0)),            # cos, q tile
            pl.BlockSpec((tq, D), lambda b, i: (i, 0)),            # signed sin, q tile
            pl.BlockSpec((T, D), lambda b, i: (0, 0)),             # cos, k
            pl.BlockSpec((T, D), lambda b, i: (0, 0)),             # signed sin, k
            pl.BlockSpec((E, E), lambda b, i: (0, 0)),             # Wo^T
            pl.BlockSpec((1, E), lambda b, i: (0, 0)),             # bo
        ],
        out_specs=pl.BlockSpec((None, tq, E), lambda b, i: (b, i, 0)),
        scratch_shapes=[pltpu.VMEM((tq, E), compute_dtype)],
        compiler_params=pltpu.CompilerParams(
            dimension_semantics=("parallel", "parallel"),
            vmem_limit_bytes=vmem_limit),
    )(qkv, qkv, qkv, cos, sin_signed, cos, sin_signed, wo_t, bo.reshape(1, E))
    # TODO(synk): for long sequences add a kv grid axis with online softmax
    # (flash) instead of keeping full-T keys resident; for very large E, tile
    # the fused out-projection instead of holding a full (E, E) Wo block.


# ------------------------------ glue / params -------------------------------

def rope_cos_sin(seq_len, dim, theta=10000.0):
    """Full (T, D) tables, exactly matching the torch module (reference path)."""
    inv_freq = 1.0 / (theta ** (jnp.arange(0, dim, 2, dtype=jnp.float32) / dim))
    t = jnp.arange(seq_len, dtype=jnp.float32)
    freqs = jnp.einsum("i,j->ij", t, inv_freq)
    emb = jnp.concatenate([freqs, freqs], axis=-1)
    return jnp.cos(emb), jnp.sin(emb)


def rope_kernel_tables(seq_len, dim, theta=10000.0):
    """cos (T, D) and sign-folded sin (T, D): rotate_half(x)*sin == roll(x, D/2)*sin_signed."""
    inv_freq = 1.0 / (theta ** (jnp.arange(0, dim, 2, dtype=jnp.float32) / dim))
    t = jnp.arange(seq_len, dtype=jnp.float32)
    freqs = jnp.einsum("i,j->ij", t, inv_freq)                 # (T, D/2)
    cos = jnp.cos(jnp.concatenate([freqs, freqs], axis=-1))    # (T, D)
    sin_h = jnp.sin(freqs)
    sin_signed = jnp.concatenate([-sin_h, sin_h], axis=-1)     # (T, D)
    return cos, sin_signed


def xavier_uniform(key, shape, gain):
    fan_out, fan_in = shape
    bound = gain * math.sqrt(6.0 / (fan_in + fan_out))
    return jax.random.uniform(key, shape, jnp.float32, -bound, bound)


def init_params(key, embed_dim):
    gain = math.sqrt(2.0)  # nn.init.calculate_gain('relu')
    ks = jax.random.split(key, 4)
    p = {}
    for name, k in zip(("q", "k", "v", "o"), ks):
        p["w" + name] = xavier_uniform(k, (embed_dim, embed_dim), gain)
        p["b" + name] = jnp.zeros((embed_dim,), jnp.float32)
    return p


def pack_params(params, scaling, compute_dtype=jnp.float32):
    """One-time prep: fold q scaling, concat QKV, pre-transpose, cast weights."""
    wqkv_t = jnp.concatenate(
        [params["wq"].T * scaling, params["wk"].T, params["wv"].T],
        axis=1).astype(compute_dtype)                                   # (E, 3E)
    bqkv = jnp.concatenate(
        [params["bq"] * scaling, params["bk"], params["bv"]]).astype(jnp.float32)
    return {"wqkv_t": wqkv_t, "bqkv": bqkv,
            "wo_t": params["wo"].T.astype(compute_dtype),
            "bo": params["bo"].astype(jnp.float32)}


def luca_attention_forward(x, packed, num_heads, rope_theta=10000.0,
                           compute_dtype=jnp.float32):
    B, T, E = x.shape
    D = E // num_heads

    # Fused Q/K/V projection: one tiled matmul, scaling already folded in.
    # With compute_dtype=bf16 the qkv handoff is emitted in bf16 (halves the
    # HBM round trip between the two pallas_calls).
    qkv = linear_nt(x.reshape(B * T, E), packed["wqkv_t"], packed["bqkv"],
                    compute_dtype=compute_dtype, out_dtype=compute_dtype)
    qkv = qkv.reshape(B, T, 3 * E)                       # free reshape, no transpose

    cos, sin_signed = rope_kernel_tables(T, D, theta=rope_theta)

    # Fused RoPE + attention + out_proj, writing straight into (B, T, E).
    return rope_attention_outproj(qkv, cos, sin_signed, packed["wo_t"],
                                  packed["bo"], num_heads=num_heads,
                                  compute_dtype=compute_dtype)
    # TODO(synk): past_key_value / cross-attention / attention_mask /
    # layer_head_mask / dropout / output_attentions branches of the PyTorch
    # forward are not wired in (inference self-attention path only).


# ------------------------------- reference ----------------------------------

def _reference(x, params, num_heads, rope_theta=10000.0):
    B, T, E = x.shape
    H = num_heads
    D = E // H
    scaling = D ** (-0.5)

    def lin(t, w, b):
        return t @ w.T + b

    q = lin(x, params["wq"], params["bq"]) * scaling
    k = lin(x, params["wk"], params["bk"])
    v = lin(x, params["wv"], params["bv"])

    def shape_heads(t):
        return t.reshape(B, T, H, D).transpose(0, 2, 1, 3).reshape(B * H, T, D)

    q, k, v = shape_heads(q), shape_heads(k), shape_heads(v)
    cos, sin = rope_cos_sin(T, D, theta=rope_theta)

    def rope(t):
        half = D // 2
        rot = jnp.concatenate([-t[..., half:], t[..., :half]], axis=-1)
        return t * cos[None] + rot * sin[None]

    q, k = rope(q), rope(k)
    w = jnp.einsum("bqd,bkd->bqk", q, k)
    p = jax.nn.softmax(w, axis=-1)
    o = jnp.einsum("bqk,bkd->bqd", p, v)
    o = o.reshape(B, H, T, D).transpose(0, 2, 1, 3).reshape(B, T, E)
    return lin(o, params["wo"], params["bo"])


# --------------------------------- main --------------------------------------

if __name__ == "__main__":
    B, T, E, H = 2, 16, 256, 2   # head_dim = 128 (lane-aligned head slices)
    key = jax.random.PRNGKey(0)
    kx, kp = jax.random.split(key)
    x = jax.random.normal(kx, (B, T, E), jnp.float32)
    params = init_params(kp, E)

    # compute_dtype=jnp.bfloat16 enables bf16 MXU operands + bf16 qkv handoff
    # (f32 accumulation kept); f32 here so the reference check stays tight.
    compute_dtype = jnp.float32
    packed = pack_params(params, scaling=(E // H) ** (-0.5),
                         compute_dtype=compute_dtype)

    out = luca_attention_forward(x, packed, num_heads=H,
                                 compute_dtype=compute_dtype)
    out = jax.block_until_ready(out)

    ref = _reference(x, params, num_heads=H)
    assert out.shape == (B, T, E)
    assert jnp.allclose(out, ref, atol=2e-2, rtol=2e-2), "mismatch vs reference"

    print("KERNEL_OK")
</pallas_src>

<mosaic_0001>
module attributes {stable_mosaic.version = 11 : i64} {
  func.func @_linear_nt_kernel(%arg0: i32, %arg1: i32, %arg2: i32, %arg3: memref<32x256xf32, #tpu.memory_space<vmem>>, %arg4: memref<256x384xf32, #tpu.memory_space<vmem>>, %arg5: memref<1x384xf32, #tpu.memory_space<vmem>>, %arg6: memref<32x384xf32, #tpu.memory_space<vmem>>, %arg7: memref<32x384xf32, #tpu.memory_space<vmem>>) attributes {dimension_semantics = [#tpu.dimension_semantics<parallel>, #tpu.dimension_semantics<parallel>, #tpu.dimension_semantics<arbitrary>], iteration_bounds = array<i64: 1, 2, 1>, scalar_prefetch = 0 : i64, scratch_operands = 1 : i64, tpu.core_type = #tpu.core_type<tc>, window_params = [{transform_indices = @transform_0, window_bounds = array<i64: 32, 256>}, {transform_indices = @transform_1, window_bounds = array<i64: 256, 384>}, {transform_indices = @transform_2, window_bounds = array<i64: 1, 384>}, {transform_indices = @transform_3, window_bounds = array<i64: 32, 384>}]} {
    %c0_i32 = arith.constant 0 : i32
    %0 = arith.cmpi eq, %arg2, %c0_i32 : i32
    %1 = arith.extui %0 : i1 to i32
    %c0_i32_0 = arith.constant 0 : i32
    %2 = arith.cmpi ne, %1, %c0_i32_0 : i32
    scf.if %2 {
      %cst_10 = arith.constant 0.000000e+00 : f32
      %12 = vector.broadcast %cst_10 : f32 to vector<32x384xf32>
      %c0_11 = arith.constant 0 : index
      %c0_12 = arith.constant 0 : index
      %13 = vector.load %arg7[%c0_11, %c0_12] : memref<32x384xf32, #tpu.memory_space<vmem>>, vector<32x384xf32>
      tpu.vector_store %arg7[%c0_11, %c0_12], %12 {strides = array<i32>} : memref<32x384xf32, #tpu.memory_space<vmem>>, vector<32x384xf32>,
    } else {
    }
    %c0 = arith.constant 0 : index
    %c0_1 = arith.constant 0 : index
    %3 = vector.load %arg7[%c0, %c0_1] : memref<32x384xf32, #tpu.memory_space<vmem>>, vector<32x384xf32>
    %c0_2 = arith.constant 0 : index
    %c0_3 = arith.constant 0 : index
    %4 = vector.load %arg3[%c0_2, %c0_3] : memref<32x256xf32, #tpu.memory_space<vmem>>, vector<32x256xf32>
    %c0_4 = arith.constant 0 : index
    %c0_5 = arith.constant 0 : index
    %5 = vector.load %arg4[%c0_4, %c0_5] : memref<256x384xf32, #tpu.memory_space<vmem>>, vector<256x384xf32>
    %cst = arith.constant dense<0.000000e+00> : vector<32x384xf32>
    %6 = tpu.matmul %4, %5, %cst {dimension_numbers = #tpu.dot_dimension_numbers<[1], [0], [0], [1], [0, 0, 1, 1], [], []>} : vector<32x256xf32>, vector<256x384xf32>, vector<32x384xf32> -> vector<32x384xf32>
    %7 = arith.addf %3, %6 : vector<32x384xf32>
    %c0_6 = arith.constant 0 : index
    %c0_7 = arith.constant 0 : index
    %8 = vector.load %arg7[%c0_6, %c0_7] : memref<32x384xf32, #tpu.memory_space<vmem>>, vector<32x384xf32>
    tpu.vector_store %arg7[%c0_6, %c0_7], %7 {strides = array<i32>} : memref<32x384xf32, #tpu.memory_space<vmem>>, vector<32x384xf32>,
    %c0_i32_8 = arith.constant 0 : i32
    %9 = arith.cmpi eq, %arg2, %c0_i32_8 : i32
    %10 = arith.extui %9 : i1 to i32
    %c0_i32_9 = arith.constant 0 : i32
    %11 = arith.cmpi ne, %10, %c0_i32_9 : i32
    scf.if %11 {
      %c0_10 = arith.constant 0 : index
      %c0_11 = arith.constant 0 : index
      %12 = vector.load %arg7[%c0_10, %c0_11] : memref<32x384xf32, #tpu.memory_space<vmem>>, vector<32x384xf32>
      %c0_12 = arith.constant 0 : index
      %c0_13 = arith.constant 0 : index
      %13 = vector.load %arg5[%c0_12, %c0_13] : memref<1x384xf32, #tpu.memory_space<vmem>>, vector<1x384xf32>
      %14 = vector.broadcast %13 : vector<1x384xf32> to vector<32x384xf32>
      %15 = arith.addf %12, %14 : vector<32x384xf32>
      %c0_14 = arith.constant 0 : index
      %c0_15 = arith.constant 0 : index
      %16 = vector.load %arg6[%c0_14, %c0_15] : memref<32x384xf32, #tpu.memory_space<vmem>>, vector<32x384xf32>
      tpu.vector_store %arg6[%c0_14, %c0_15], %15 {strides = array<i32>} : memref<32x384xf32, #tpu.memory_space<vmem>>, vector<32x384xf32>,
    } else {
    }
    return
  }
  func.func @transform_0(%arg0: i32, %arg1: i32, %arg2: i32) -> (i32, i32) {
    %c0_i32 = arith.constant 0 : i32
    return %arg0, %arg2 : i32, i32
  }
  func.func @transform_1(%arg0: i32, %arg1: i32, %arg2: i32) -> (i32, i32) {
    %c0_i32 = arith.constant 0 : i32
    return %arg2, %arg1 : i32, i32
  }
  func.func @transform_2(%arg0: i32, %arg1: i32, %arg2: i32) -> (i32, i32) {
    %c0_i32 = arith.constant 0 : i32
    %c0_i32_0 = arith.constant 0 : i32
    return %c0_i32, %arg1 : i32, i32
  }
  func.func @transform_3(%arg0: i32, %arg1: i32, %arg2: i32) -> (i32, i32) {
    %c0_i32 = arith.constant 0 : i32
    return %arg0, %arg1 : i32, i32
  }
}

</mosaic_0001>

<bundles_post_ra>
// kernel: tpu_custom_call.1
= control target key start
LH: loop header
LB: loop body
LE: loop exit
PB: predicated region body
PF: predicated region fallthrough
CT: control target
= control target key end

     0   :  { %s1465_s0 = inlined_call_operand.hbm [shape: f32[32,256], index: 0, kind: input, shape index: {}]   ;;  %s1466_s1 = inlined_call_operand.hbm [shape: f32[256,768], index: 1, kind: input, shape index: {}]   ;;  %s1467_s2 = inlined_call_operand.hbm [shape: f32[1,768], index: 2, kind: input, shape index: {}]   ;;  %s1468_s3 = inlined_call_operand.hbm [shape: f32[32,768], index: 3, kind: output, shape index: {}]  }
   0x1   :  { %1469 = sst [smem:[#allocation13_spill]] %s1465_s0 }
   0x2   :  { %1470 = sst [smem:[#allocation14_spill]] %s1466_s1 }
   0x3   :  { %8 = vsyncpa [#allocation4], 0 }
   0x4   :  { %9 = vsyncpa [#allocation7], 0 }
   0x5   :  { %11 = vsyncpa [#allocation7 + $0x1], 0 }
   0x6   :  { %12 = vsyncpa [#allocation5], 0 }
   0x7   :  { %14 = vsyncpa [#allocation5 + $0x1], 0  ;;  %s1156_s12 = smov 0   ;;  %s1158_s13 = smov 0  }
   0x8   :  { %s1160_s14 = smov 0   ;;  %s1162_s15 = smov 0  }
   0x9   :  { %s1164_s16 = smov 0   ;;  %s1166_s17 = smov 0  }
   0xa LB: > { %s35_s18 = sadd.s32 1, %s1121_s16  ;;  %s76_s19 = sadd.s32 1, %s1113_s14  ;;  %s1125_s17 = sphi %s1166_s17, %s20_s17   ;;  %s1121_s16 = sphi %s1164_s16, %s1482_s16   ;;  %s1117_s15 = sphi %s1162_s15, %s1481_s15   ;;  %s1113_s14 = sphi %s1160_s14, %s1480_s14   ;;  %s1109_s13 = sphi %s1158_s13, %s1479_s13   ;;  %s1105_s12 = sphi %s1156_s12, %s1478_s12  }
   0xb   : > { %p37_p0 = scmp.ge.s32.totalorder %s35_s18, 2  ;;  %p83_p1 = scmp.ne.s32.totalorder %s1113_s14, %s1109_s13 }
   0xc   : > { %p84_p2 = scmp.eq.s32.totalorder %s1125_s17, 0  ;;  %p817_p3 = scmp.ge.s32.totalorder %s1125_s17, 2 }
   0xd   : > { %s1484_s18 = smov (%p37_p0, %s35_s18), 0  ;;  %p889_p5 = scmp.lt.s32.totalorder %s1125_s17, 2 }
   0xe   : > { %p85_p4 = por %p84_p2, %p83_p1  ;;  %s72_s20 = ssub.s32 %s1121_s16, %s1484_s18 }
   0xf   : > { %s187_s21 = sand.u32 1, %s1125_s17   ;;  %p74_p6 = scmp.eq.s32.totalorder %s72_s20, 0 }
  0x10   : > { %s189_s22 = sand.u32 1, %s1113_s14   ;;  %s824_s23 = smul.u32 24, %s1121_s16 }
  0x11   : > { %s1204_s24 = scalar_select %p74_p6, %s1113_s14, %s76_s19  }
  0x12   : > { %s858_s25 = smul.u32 768, %s189_s22  ;;  %s1471_s1 = sld [smem:[#allocation14_spill]] }
  0x13   : > { %p1211_p7 = pnand %p889_p5, %p85_p4  ;;  %s1215_s6 = scalar_lea.sflag [#allocation7], %s187_s21 }
  0x14   : > { %s191_s4 = scalar_lea.vmem [#allocation6], %s858_s25  ;;  %s1127_s7 = smov 768  }
  0x15   : > { %s202_s5 = sshll.u32 %s191_s4, 4  ;;  %s1128_s8 = smov 384   ;;  %s203_s5 = int_to_ptr.vmem [resolvable:$true] %s202_s5 }
  0x16   : > { %s1129_s9 = smov 24   ;;  %s1221_s10 = sadd.s32 4294967295, %s1125_s17  }
  0x17   : > { %s814_s11 = sadd.s32 4294967294, %s1125_s17   ;;  %p89_p8 = scmp.ne.s32.totalorder %s1109_s13, %s1105_s12 }
  0x18   : > { %s199_s28 = scalar_lea.hbm %s1471_s1, %s824_s23  ;;  %p90_p9 = scmp.eq.s32.totalorder %s1221_s10, 0 }
  0x19   : > { %s200_s29 = sshll.u32 %s199_s28, 4  ;;  %p141_p10 = scmp.eq.s32.totalorder %s1221_s10, 1  ;;  %s201_s29 = int_to_ptr.hbm [resolvable:$true] %s200_s29 }
  0x1a   : > { %880 = dma.hbm_to_vmem [thread:$0]  (!%p1211_p7), %s201_s29, 12288, %s203_s5, %s1215_s6, %s1127_s7, %s1128_s8, %s1129_s9  }
  0x1b   : > { %p147_p11 = scmp.eq.s32.totalorder %s814_s11, 1  ;;  %p1230_p12 = por %p90_p9, %p89_p8 }
  0x1c   : > { %p815_p13 = scmp.ge.s32.totalorder %s1125_s17, 1  ;;  %p1238_p0 = por %p141_p10, %p83_p1 }
  0x1d   : > { %p1242_p2 = por %p147_p11, %p89_p8  ;;  %p154_p4 = scmp.lt.s32.totalorder %s1125_s17, 3 }
  0x1e   : > { %s1476_s0 = sld [smem:[#allocation13_spill]]  ;;  %s1130_s28 = smov [#allocation3]  }
  0x1f   : > { %p1250_p5 = pnand %p815_p13, %p154_p4  ;;  %s173_s29 = sshll.u32 %s1130_s28, 4  ;;  %s174_s29 = int_to_ptr.vmem [resolvable:$true] %s173_s29 }
  0x20   : > { %s859_s4 = smul.u32 3, %s189_s22  ;;  %s1131_s11 = smov 256  }
  0x21   : > { %p873_p1 = pneg %p1250_p5  ;;  %s217_s5 = smul.u32 3, %s1121_s16 }
  0x22   : > { %s1132_s23 = smov 16  }
  0x23   : > { %p874_p6 = pnand %p873_p1, %p90_p9  ;;  %s220_s9 = scalar_lea.hbm %s1467_s2, %s217_s5 }
  0x24   : > { %s171_s26 = sshll.u32 %s1476_s0, 4  ;;  %s222_s25 = sshll.u32 %s220_s9, 4  ;;  %s172_s26 = int_to_ptr.hbm [resolvable:$true] %s171_s26  ;;  %s223_s25 = int_to_ptr.hbm [resolvable:$true] %s222_s25 }
  0x25   : > { %876 = dma.hbm_to_vmem [thread:$0]  (!%p874_p6), %s172_s26, 1024, %s174_s29, [#allocation4], %s1131_s11, %s1131_s11, %s1132_s23  }
  0x26   : > { %s216_s0 = scalar_lea.vmem [#allocation8], %s859_s4  ;;  %233 = sbr.rel (%p1250_p5) target bundleno = 270 (0x10e), region = 32 }
  0x27   : > { %s224_s1 = sshll.u32 %s216_s0, 4  ;;  %s225_s1 = int_to_ptr.vmem [resolvable:$true] %s224_s1 }
  0x28   : > { %883 = dma.hbm_to_vmem [thread:$0]  (!%p1211_p7), %s223_s25, 48, %s225_s1, %s1215_s6  }
  0x2b   : > { %1092 = dma.done.wait (%p90_p9), [#allocation4], 1024  }
  0x2c   : > { %1094 = vsyncadd (%p90_p9), [#allocation4], 4294966272  ;;  %s240_s22 = sand.u32 1, %s1221_s10   ;;  %s1275_s26 = sand.u32 1, %s1109_s13  }
  0x2d   : > { %s860_s0 = smul.u32 768, %s1275_s26  ;;  %s241_s28 = scalar_lea.sflag [#allocation7], %s240_s22 }
  0x2f   : > { %s1278_s30 = scalar_lea.vmem [#allocation6], %s860_s0 }
  0x30   : > { %1096 = dma.done.wait (%p1230_p12), %s241_s28, 12336  }
  0x31   : > { %1098 = vsyncadd (%p1230_p12), %s241_s28, 4294954960  ;;  %v372_v0 = vld [vmem:[%s1278_s30 + $0x170] sm:$0xff]  ;;  %v369_v2 = vld [vmem:[%s1278_s30 + $0x158] sm:$0xff]  ;;  %s861_s1 = smul.u32 3, %s1275_s26  ;;  %s1059_s22 = scalar_lea.hbm %s1468_s3, 192 }
  0x32   : > { %v420_v1 = vld [vmem:[%s1278_s30 + $0x2f0] sm:$0xff]  ;;  %480 = vmatpush.msra.mxu2 %v372_v0  ;;  %v417_v3 = vld [vmem:[%s1278_s30 + $0x2d8] sm:$0xff]  ;;  %v366_v4 = vld [vmem:[%s1278_s30 + $0x140] sm:$0xff]  ;;  %s862_s10 = smul.u32 96, %s1275_s26 }
  0x33   : > { %509 = vmatpush.msra.mxu3 %v420_v1  ;;  %v414_v5 = vld [vmem:[%s1278_s30 + $0x2c0] sm:$0xff]  ;;  %v371_v6 = vld [vmem:[%s1278_s30 + $0x168] sm:$0xff]  ;;  %v368_v8 = vld [vmem:[%s1278_s30 + $0x150] sm:$0xff]  ;;  %s254_s6 = scalar_lea.vmem [#allocation8], %s861_s1  ;;  %s825_s27 = smul.u32 24, %s1117_s15 }
  0x34   : > { %v419_v7 = vld [vmem:[%s1278_s30 + $0x2e8] sm:$0xff]  ;;  %481 = vmatpush.msra.mxu2 %v369_v2  ;;  %v416_v9 = vld [vmem:[%s1278_s30 + $0x2d0] sm:$0xff]  ;;  %422 = vmatpush.msra.mxu0 %v371_v6  ;;  %v365_v12 = vld [vmem:[%s1278_s30 + $0x138] sm:$0xff]  ;;  %s1412_s19 = scalar_lea.vmem [#allocation9], %s862_s10  ;;  %s668_s15 = scalar_lea.sflag [#allocation5], %s1275_s26 }
  0x35   : > { %510 = vmatpush.msra.mxu3 %v417_v3  ;;  %451 = vmatpush.msra.mxu1 %v419_v7  ;;  %v363_v10 = vld [vmem:[%s1278_s30 + $0x128] sm:$0xff]  ;;  %v413_v13 = vld [vmem:[%s1278_s30 + $0x2b8] sm:$0xff]  ;;  %v360_v14 = vld [vmem:[%s1278_s30 + $0x110] sm:$0xff]  ;;  %s682_s5 = scalar_lea.hbm %s1468_s3, %s825_s27  ;;  %s683_s7 = sshll.u32 %s1412_s19, 4  ;;  %s684_s7 = int_to_ptr.vmem [resolvable:$true] %s683_s7 }
  0x36   : > { %v411_v11 = vld [vmem:[%s1278_s30 + $0x2a8] sm:$0xff]  ;;  %482 = vmatpush.msra.mxu2 %v366_v4  ;;  %423 = vmatpush.msra.mxu0 %v368_v8  ;;  %v408_v15 = vld [vmem:[%s1278_s30 + $0x290] sm:$0xff]  ;;  %v362_v16 = vld [vmem:[%s1278_s30 + $0x120] sm:$0xff]  ;;  %s685_s8 = sshll.u32 %s682_s5, 4  ;;  %s686_s8 = int_to_ptr.hbm [resolvable:$true] %s685_s8 }
  0x37   : > { %511 = vmatpush.msra.mxu3 %v414_v5  ;;  %452 = vmatpush.msra.mxu1 %v416_v9  ;;  %v410_v17 = vld [vmem:[%s1278_s30 + $0x2a0] sm:$0xff]  ;;  %v357_v18 = vld [vmem:[%s1278_s30 + $0xf8] sm:$0xff]  ;;  %v359_v20 = vld [vmem:[%s1278_s30 + $0x108] sm:$0xff]  ;;  %s1053_s9 = sshra.s32 %s686_s8, 4  ;;  %s1054_s9 = int_to_ptr.hbm [resolvable:$true] %s1053_s9 }
  0x38   : > { %483 = vmatpush.msra.mxu2 %v363_v10  ;;  %424 = vmatpush.msra.mxu0 %v365_v12  ;;  %v405_v19 = vld [vmem:[%s1278_s30 + $0x278] sm:$0xff]  ;;  %v407_v21 = vld [vmem:[%s1278_s30 + $0x288] sm:$0xff]  ;;  %v354_v22 = vld [vmem:[%s1278_s30 + $0xe0] sm:$0xff]  ;;  %s1055_s11 = scalar_lea.hbm %s1054_s9, 96  ;;  %p1060_p10 = scmp.lt.s32.totalorder %s1054_s9, %s1468_s3 }
  0x39   : > { %512 = vmatpush.msra.mxu3 %v411_v11  ;;  %453 = vmatpush.msra.mxu1 %v413_v13  ;;  %v402_v23 = vld [vmem:[%s1278_s30 + $0x260] sm:$0xff]  ;;  %v356_v24 = vld [vmem:[%s1278_s30 + $0xf0] sm:$0xff]  ;;  %v351_v26 = vld [vmem:[%s1278_s30 + $0xc8] sm:$0xff]  ;;  %p1056_p7 = scmp.ne.s32.totalorder %s1054_s9, %s1055_s11  ;;  %p1061_p11 = scmp.lt.s32.totalorder %s1059_s22, %s1055_s11 }
  0x3a   : > { %484 = vmatpush.msra.mxu2 %v360_v14  ;;  %425 = vmatpush.msra.mxu0 %v362_v16  ;;  %v404_v25 = vld [vmem:[%s1278_s30 + $0x270] sm:$0xff]  ;;  %v399_v27 = vld [vmem:[%s1278_s30 + $0x248] sm:$0xff]  ;;  %v353_v28 = vld [vmem:[%s1278_s30 + $0xd8] sm:$0xff] }
  0x3b   : > { %513 = vmatpush.msra.mxu3 %v408_v15  ;;  %454 = vmatpush.msra.mxu1 %v410_v17  ;;  %v401_v29 = vld [vmem:[%s1278_s30 + $0x258] sm:$0xff]  ;;  %v348_v30 = vld [vmem:[%s1278_s30 + $0xb0] sm:$0xff]  ;;  %v350_v32 = vld [vmem:[%s1278_s30 + $0xc0] sm:$0xff]  ;;  %p1057_p8 = pnand %p1056_p7, %p1238_p0  ;;  %p1062_p12 = por %p1061_p11, %p1060_p10 }
  0x3c   : > { %485 = vmatpush.msra.mxu2 %v357_v18  ;;  %426 = vmatpush.msra.mxu0 %v359_v20  ;;  %v396_v31 = vld [vmem:[%s1278_s30 + $0x230] sm:$0xff]  ;;  %v398_v33 = vld [vmem:[%s1278_s30 + $0x240] sm:$0xff]  ;;  %v345_v34 = vld [vmem:[%s1278_s30 + $0x98] sm:$0xff] }
  0x3d   : > { %514 = vmatpush.msra.mxu3 %v405_v19  ;;  %455 = vmatpush.msra.mxu1 %v407_v21  ;;  %v393_v35 = vld [vmem:[%s1278_s30 + $0x218] sm:$0xff]  ;;  %v347_v36 = vld [vmem:[%s1278_s30 + $0xa8] sm:$0xff]  ;;  %v342_v38 = vld [vmem:[%s1278_s30 + $0x80] sm:$0xff]  ;;  %p1058_p9 = pneg %p1057_p8 }
  0x3e   : > { %486 = vmatpush.msra.mxu2 %v354_v22  ;;  %427 = vmatpush.msra.mxu0 %v356_v24  ;;  %v395_v37 = vld [vmem:[%s1278_s30 + $0x228] sm:$0xff]  ;;  %v390_v39 = vld [vmem:[%s1278_s30 + $0x200] sm:$0xff]  ;;  %v344_v40 = vld [vmem:[%s1278_s30 + $0x90] sm:$0xff] }
  0x3f   : > { %515 = vmatpush.msra.mxu3 %v402_v23  ;;  %456 = vmatpush.msra.mxu1 %v404_v25  ;;  %v392_v41 = vld [vmem:[%s1278_s30 + $0x210] sm:$0xff]  ;;  %v339_v42 = vld [vmem:[%s1278_s30 + $0x68] sm:$0xff]  ;;  %v341_v44 = vld [vmem:[%s1278_s30 + $0x78] sm:$0xff]  ;;  %p1063_p13 = pnand %p1062_p12, %p1058_p9 }
  0x40   : > { %487 = vmatpush.msra.mxu2 %v351_v26  ;;  %428 = vmatpush.msra.mxu0 %v353_v28  ;;  %v387_v43 = vld [vmem:[%s1278_s30 + $0x1e8] sm:$0xff]  ;;  %v389_v45 = vld [vmem:[%s1278_s30 + $0x1f8] sm:$0xff]  ;;  %v336_v46 = vld [vmem:[%s1278_s30 + $0x50] sm:$0xff] }
  0x41   : > { %516 = vmatpush.msra.mxu3 %v399_v27  ;;  %457 = vmatpush.msra.mxu1 %v401_v29  ;;  %v384_v47 = vld [vmem:[%s1278_s30 + $0x1d0] sm:$0xff]  ;;  %v338_v48 = vld [vmem:[%s1278_s30 + $0x60] sm:$0xff]  ;;  %v333_v50 = vld [vmem:[%s1278_s30 + $0x38] sm:$0xff] }
  0x42   : > { %488 = vmatpush.msra.mxu2 %v348_v30  ;;  %429 = vmatpush.msra.mxu0 %v350_v32  ;;  %v386_v49 = vld [vmem:[%s1278_s30 + $0x1e0] sm:$0xff]  ;;  %v381_v51 = vld [vmem:[%s1278_s30 + $0x1b8] sm:$0xff]  ;;  %v335_v52 = vld [vmem:[%s1278_s30 + $0x48] sm:$0xff] }
  0x43   : > { %517 = vmatpush.msra.mxu3 %v396_v31  ;;  %458 = vmatpush.msra.mxu1 %v398_v33  ;;  %v383_v53 = vld [vmem:[%s1278_s30 + $0x1c8] sm:$0xff]  ;;  %v330_v54 = vld [vmem:[%s1278_s30 + $0x20] sm:$0xff]  ;;  %v332_v56 = vld [vmem:[%s1278_s30 + $0x30] sm:$0xff] }
  0x44   : > { %489 = vmatpush.msra.mxu2 %v345_v34  ;;  %430 = vmatpush.msra.mxu0 %v347_v36  ;;  %v378_v55 = vld [vmem:[%s1278_s30 + $0x1a0] sm:$0xff]  ;;  %v380_v57 = vld [vmem:[%s1278_s30 + $0x1b0] sm:$0xff]  ;;  %v327_v58 = vld [vmem:[%s1278_s30 + $0x8] sm:$0xff] }
  0x45   : > { %518 = vmatpush.msra.mxu3 %v393_v35  ;;  %459 = vmatpush.msra.mxu1 %v395_v37  ;;  %v375_v59 = vld [vmem:[%s1278_s30 + $0x188] sm:$0xff]  ;;  %v1344_v60 = vld [vmem:[#allocation3] sm:$0xff]  ;;  %v373_v62 = vld [vmem:[%s1278_s30 + $0x178] sm:$0xff] }
  0x46   : > { %490 = vmatpush.msra.mxu2 %v342_v38  ;;  %431 = vmatpush.msra.mxu0 %v344_v40  ;;  %v1346_v61 = vld [vmem:[#allocation3 + $0x8] sm:$0xff]  ;;  %v421_v63 = vld [vmem:[%s1278_s30 + $0x2f8] sm:$0xff]  ;;  %v370_v2 = vld [vmem:[%s1278_s30 + $0x160] sm:$0xff] }
  0x47   : > { %519 = vmatpush.msra.mxu3 %v390_v39  ;;  %460 = vmatpush.msra.mxu1 %v392_v41  ;;  %v329_v0 = vld [vmem:[%s1278_s30 + $0x18] sm:$0xff]  ;;  %v418_v3 = vld [vmem:[%s1278_s30 + $0x2e0] sm:$0xff]  ;;  %v367_v6 = vld [vmem:[%s1278_s30 + $0x148] sm:$0xff] }
  0x48   : > { %491 = vmatpush.msra.mxu2 %v339_v42  ;;  %432 = vmatpush.msra.mxu0 %v341_v44  ;;  %v377_v1 = vld [vmem:[%s1278_s30 + $0x198] sm:$0xff]  ;;  %v326_v4 = vld [vmem:[%s1278_s30] sm:$0xff]  ;;  %v415_v7 = vld [vmem:[%s1278_s30 + $0x2c8] sm:$0xff] }
  0x49   : > { %520 = vmatpush.msra.mxu3 %v387_v43  ;;  %461 = vmatpush.msra.mxu1 %v389_v45  ;;  %v374_v5 = vld [vmem:[%s1278_s30 + $0x180] sm:$0xff]  ;;  %v364_v8 = vld [vmem:[%s1278_s30 + $0x130] sm:$0xff]  ;;  %v1366_v11 = vld [vmem:[#allocation3 + $0x18] sm:$0xff] }
  0x4a   : > { %492 = vmatpush.msra.mxu2 %v336_v46  ;;  %433 = vmatpush.msra.mxu0 %v338_v48  ;;  %v412_v9 = vld [vmem:[%s1278_s30 + $0x2b0] sm:$0xff]  ;;  %v361_v12 = vld [vmem:[%s1278_s30 + $0x118] sm:$0xff]  ;;  %v358_v14 = vld [vmem:[%s1278_s30 + $0x100] sm:$0xff] }
  0x4b   : > { %521 = vmatpush.msra.mxu3 %v384_v47  ;;  %462 = vmatpush.msra.mxu1 %v386_v49  ;;  %v1364_v10 = vld [vmem:[#allocation3 + $0x10] sm:$0xff]  ;;  %v409_v13 = vld [vmem:[%s1278_s30 + $0x298] sm:$0xff]  ;;  %v406_v15 = vld [vmem:[%s1278_s30 + $0x280] sm:$0xff] }
  0x4c   : > { %493 = vmatpush.msra.mxu2 %v333_v50  ;;  %434 = vmatpush.msra.mxu0 %v335_v52  ;;  %v355_v16 = vld [vmem:[%s1278_s30 + $0xe8] sm:$0xff]  ;;  %v352_v18 = vld [vmem:[%s1278_s30 + $0xd0] sm:$0xff]  ;;  %v1380_v20 = vld [vmem:[#allocation3 + $0x20] sm:$0xff] }
  0x4d   : > { %522 = vmatpush.msra.mxu3 %v381_v51  ;;  %463 = vmatpush.msra.mxu1 %v383_v53  ;;  %v403_v17 = vld [vmem:[%s1278_s30 + $0x268] sm:$0xff]  ;;  %v400_v19 = vld [vmem:[%s1278_s30 + $0x250] sm:$0xff]  ;;  %v349_v22 = vld [vmem:[%s1278_s30 + $0xb8] sm:$0xff] }
  0x4e   : > { %494 = vmatpush.msra.mxu2 %v330_v54  ;;  %435 = vmatpush.msra.mxu0 %v332_v56  ;;  %v1382_v21 = vld [vmem:[#allocation3 + $0x28] sm:$0xff]  ;;  %v397_v23 = vld [vmem:[%s1278_s30 + $0x238] sm:$0xff]  ;;  %v346_v24 = vld [vmem:[%s1278_s30 + $0xa0] sm:$0xff] }
  0x4f   : > { %523 = vmatpush.msra.mxu3 %v378_v55  ;;  %464 = vmatpush.msra.mxu1 %v380_v57  ;;  %v394_v25 = vld [vmem:[%s1278_s30 + $0x220] sm:$0xff]  ;;  %v343_v26 = vld [vmem:[%s1278_s30 + $0x88] sm:$0xff]  ;;  %v340_v28 = vld [vmem:[%s1278_s30 + $0x70] sm:$0xff] }
  0x50   : > { %495 = vmatpush.msra.mxu2 %v327_v58  ;;  %436 = vmatpush.msra.mxu0 %v329_v0  ;;  %v391_v27 = vld [vmem:[%s1278_s30 + $0x208] sm:$0xff]  ;;  %v388_v29 = vld [vmem:[%s1278_s30 + $0x1f0] sm:$0xff]  ;;  %v325_v31 = vld [vmem:[#allocation3 + $0x38] sm:$0xff] }
  0x51   : > { %524 = vmatpush.msra.mxu3 %v375_v59  ;;  %496 = vmatmul.f32.vlgmr.msra.gmra.mxu2 %v1344_v60  ;;  %v324_v30 = vld [vmem:[#allocation3 + $0x30] sm:$0xff]  ;;  %v337_v32 = vld [vmem:[%s1278_s30 + $0x58] sm:$0xff]  ;;  %v334_v34 = vld [vmem:[%s1278_s30 + $0x40] sm:$0xff] }
  0x52   : > { %525 = vmatmul.f32.vlgmr.msra.gmra.mxu3 %v1346_v61  ;;  %826 = vmatpush.msrb.mxu2 %v373_v62  ;;  %v385_v33 = vld [vmem:[%s1278_s30 + $0x1d8] sm:$0xff]  ;;  %v382_v35 = vld [vmem:[%s1278_s30 + $0x1c0] sm:$0xff]  ;;  %v331_v36 = vld [vmem:[%s1278_s30 + $0x28] sm:$0xff] }
  0x53   : > { %842 = vmatpush.msrb.mxu3 %v421_v63  ;;  %465 = vmatpush.msra.mxu1 %v377_v1  ;;  %v379_v37 = vld [vmem:[%s1278_s30 + $0x1a8] sm:$0xff]  ;;  %v328_v38 = vld [vmem:[%s1278_s30 + $0x10] sm:$0xff]  ;;  %v635_v40 = vld [vmem:[%s254_s6] sm:$0x7] }
  0x54   : > { %827 = vmatpush.msrb.mxu2 %v370_v2  ;;  %437 = vmatpush.msra.mxu0 %v326_v4  ;;  %v376_v39 = vld [vmem:[%s1278_s30 + $0x190] sm:$0xff]  ;;  %v637_v41 = vperm.slane %v635_v40, 0  ;;  %v638_v44 = vperm.slane %v635_v40, 1 }
  0x55   : > { %843 = vmatpush.msrb.mxu3 %v418_v3  ;;  %466 = vmatpush.msra.mxu1 %v374_v5 }
  0x56   : > { %828 = vmatpush.msrb.mxu2 %v367_v6  ;;  %438 = vmatmul.f32.vlgmr.msra.gmra.mxu0 %v1344_v60 }
  0x57   : > { %844 = vmatpush.msrb.mxu3 %v415_v7  ;;  %467 = vmatmul.f32.vlgmr.msra.gmra.mxu1 %v1346_v61 }
  0x58   : > { %538 = vmatpush.msrb.mxu0 %v373_v62  ;;  %829 = vmatpush.msrb.mxu2 %v364_v8 }
  0x59   : > { %567 = vmatpush.msrb.mxu1 %v421_v63  ;;  %845 = vmatpush.msrb.mxu3 %v412_v9 }
  0x5a   : > { %499 = vmatmul.f32.gmra.mxu2 %v1364_v10  ;;  %528 = vmatmul.f32.gmra.mxu3 %v1366_v11 }
  0x5b   : > { %539 = vmatpush.msrb.mxu0 %v370_v2  ;;  %830 = vmatpush.msrb.mxu2 %v361_v12 }
  0x5c   : > { %568 = vmatpush.msrb.mxu1 %v418_v3  ;;  %846 = vmatpush.msrb.mxu3 %v409_v13 }
  0x5d   : > { %540 = vmatpush.msrb.mxu0 %v367_v6  ;;  %831 = vmatpush.msrb.mxu2 %v358_v14 }
  0x5e   : > { %569 = vmatpush.msrb.mxu1 %v415_v7  ;;  %847 = vmatpush.msrb.mxu3 %v406_v15 }
  0x5f   : > { %541 = vmatpush.msrb.mxu0 %v364_v8  ;;  %832 = vmatpush.msrb.mxu2 %v355_v16 }
  0x60   : > { %570 = vmatpush.msrb.mxu1 %v412_v9  ;;  %848 = vmatpush.msrb.mxu3 %v403_v17 }
  0x61   : > { %441 = vmatmul.f32.gmra.mxu0 %v1364_v10  ;;  %470 = vmatmul.f32.gmra.mxu1 %v1366_v11 }
  0x62   : > { %542 = vmatpush.msrb.mxu0 %v361_v12  ;;  %833 = vmatpush.msrb.mxu2 %v352_v18  ;;  %v639_v12 = vperm.slane %v635_v40, 2 }
  0x63   : > { %571 = vmatpush.msrb.mxu1 %v409_v13  ;;  %849 = vmatpush.msrb.mxu3 %v400_v19 }
  0x64   : > { %502 = vmatmul.f32.gmra.mxu2 %v1380_v20  ;;  %531 = vmatmul.f32.gmra.mxu3 %v1382_v21 }
  0x65   : > { %543 = vmatpush.msrb.mxu0 %v358_v14  ;;  %834 = vmatpush.msrb.mxu2 %v349_v22 }
  0x66   : > { %572 = vmatpush.msrb.mxu1 %v406_v15  ;;  %850 = vmatpush.msrb.mxu3 %v397_v23 }
  0x67   : > { %544 = vmatpush.msrb.mxu0 %v355_v16  ;;  %835 = vmatpush.msrb.mxu2 %v346_v24 }
  0x68   : > { %573 = vmatpush.msrb.mxu1 %v403_v17  ;;  %851 = vmatpush.msrb.mxu3 %v394_v25 }
  0x69   : > { %545 = vmatpush.msrb.mxu0 %v352_v18  ;;  %836 = vmatpush.msrb.mxu2 %v343_v26 }
  0x6a   : > { %574 = vmatpush.msrb.mxu1 %v400_v19  ;;  %852 = vmatpush.msrb.mxu3 %v391_v27 }
  0x6b   : > { %444 = vmatmul.f32.gmra.mxu0 %v1380_v20  ;;  %473 = vmatmul.f32.gmra.mxu1 %v1382_v21 }
  0x6c   : > { %546 = vmatpush.msrb.mxu0 %v349_v22  ;;  %837 = vmatpush.msrb.mxu2 %v340_v28 }
  0x6d   : > { %575 = vmatpush.msrb.mxu1 %v397_v23  ;;  %853 = vmatpush.msrb.mxu3 %v388_v29 }
  0x6e   : > { %505 = vmatmul.f32.gmra.mxu2 %v324_v30  ;;  %534 = vmatmul.f32.gmra.mxu3 %v325_v31 }
  0x6f   : > { %547 = vmatpush.msrb.mxu0 %v346_v24  ;;  %838 = vmatpush.msrb.mxu2 %v337_v32 }
  0x70   : > { %576 = vmatpush.msrb.mxu1 %v394_v25  ;;  %854 = vmatpush.msrb.mxu3 %v385_v33 }
  0x71   : > { %548 = vmatpush.msrb.mxu0 %v343_v26  ;;  %839 = vmatpush.msrb.mxu2 %v334_v34 }
  0x72   : > { %577 = vmatpush.msrb.mxu1 %v391_v27  ;;  %855 = vmatpush.msrb.mxu3 %v382_v35 }
  0x73   : > { %549 = vmatpush.msrb.mxu0 %v340_v28  ;;  %840 = vmatpush.msrb.mxu2 %v331_v36 }
  0x74   : > { %578 = vmatpush.msrb.mxu1 %v388_v29  ;;  %856 = vmatpush.msrb.mxu3 %v379_v37 }
  0x75   : > { %447 = vmatmul.f32.gmra.mxu0 %v324_v30  ;;  %476 = vmatmul.f32.gmra.mxu1 %v325_v31 }
  0x76   : > { %550 = vmatpush.msrb.mxu0 %v337_v32  ;;  %841 = vmatpush.msrb.mxu2 %v328_v38 }
  0x77   : > { %579 = vmatpush.msrb.mxu1 %v385_v33  ;;  %857 = vmatpush.msrb.mxu3 %v376_v39 }
  0x78   : > { %551 = vmatpush.msrb.mxu0 %v334_v34  ;;  %560 = vmatmul.f32.vlgmr.msrb.gmra.mxu2 %v1380_v20 }
  0x79   : > { %580 = vmatpush.msrb.mxu1 %v382_v35  ;;  %589 = vmatmul.f32.vlgmr.msrb.gmra.mxu3 %v1382_v21 }
  0x7a   : > { %552 = vmatpush.msrb.mxu0 %v331_v36 }
  0x7b   : > { %581 = vmatpush.msrb.mxu1 %v379_v37 }
  0x7c   : > { %553 = vmatpush.msrb.mxu0 %v328_v38 }
  0x7d   : > { %582 = vmatpush.msrb.mxu1 %v376_v39  ;;  %554 = vmatmul.f32.vlgmr.msrb.gmra.mxu0 %v1344_v60 }
  0x7e   : > { %583 = vmatmul.f32.vlgmr.msrb.gmra.mxu1 %v1346_v61 }
  0x80   : > { %563 = vmatmul.f32.gmra.mxu2 %v324_v30 }
  0x81   : > { %592 = vmatmul.f32.gmra.mxu3 %v325_v31 }
  0x85   : > { %557 = vmatmul.f32.gmra.mxu0 %v1364_v10 }
  0x86   : > { %586 = vmatmul.f32.gmra.mxu1 %v1366_v11 }
  0xd3   : > { %v439_v42 = vpop.f32.mrf.mxu0 }
  0xd4   : > { %v468_v43 = vpop.f32.mrf.mxu1  ;;  %v497_v46 = vpop.f32.mrf.mxu2 }
  0xd5   : > { %v469_v45 = vadd.f32 %v468_v43, %v439_v42  ;;  %v526_v47 = vpop.f32.mrf.mxu3 }
  0xd6   : > { %v527_v48 = vadd.f32 %v526_v47, %v497_v46 }
  0xd7   : > { %v643_v49 = vadd.f32 %v637_v41, %v469_v45 }
  0xd8   : > { %v644_v50 = vadd.f32 %v638_v44, %v527_v48 }
  0xd9   : > { %655 = vst [vmem:[%s1412_s19] sm:$0xff] %v643_v49 }
  0xda   : > { %656 = vst [vmem:[%s1412_s19 + $0x8] sm:$0xff] %v644_v50 }
  0xdd   : > { %v500_v51 = vpop.f32.mrf.mxu2  ;;  %v529_v52 = vpop.f32.mrf.mxu3 }
  0xde   : > { %v442_v53 = vpop.f32.mrf.mxu0  ;;  %v471_v54 = vpop.f32.mrf.mxu1  ;;  %v530_v55 = vadd.f32 %v529_v52, %v500_v51 }
  0xdf   : > { %v472_v56 = vadd.f32 %v471_v54, %v442_v53 }
  0xe0   : > { %v647_v57 = vadd.f32 %v638_v44, %v530_v55 }
  0xe1   : > { %v646_v58 = vadd.f32 %v637_v41, %v472_v56 }
  0xe2   : > { %659 = vst [vmem:[%s1412_s19 + $0x20] sm:$0xff] %v647_v57 }
  0xe3   : > { %658 = vst [vmem:[%s1412_s19 + $0x18] sm:$0xff] %v646_v58 }
  0xe7   : > { %v503_v59 = vpop.f32.mrf.mxu2  ;;  %v532_v60 = vpop.f32.mrf.mxu3 }
  0xe8   : > { %v445_v61 = vpop.f32.mrf.mxu0  ;;  %v474_v62 = vpop.f32.mrf.mxu1  ;;  %v533_v63 = vadd.f32 %v532_v60, %v503_v59 }
  0xe9   : > { %v475_v0 = vadd.f32 %v474_v62, %v445_v61 }
  0xea   : > { %v650_v1 = vadd.f32 %v638_v44, %v533_v63 }
  0xeb   : > { %v649_v2 = vadd.f32 %v637_v41, %v475_v0 }
  0xec   : > { %662 = vst [vmem:[%s1412_s19 + $0x38] sm:$0xff] %v650_v1 }
  0xed   : > { %661 = vst [vmem:[%s1412_s19 + $0x30] sm:$0xff] %v649_v2 }
  0xf1   : > { %v506_v3 = vpop.f32.mrf.mxu2  ;;  %v535_v4 = vpop.f32.mrf.mxu3 }
  0xf2   : > { %v448_v5 = vpop.f32.mrf.mxu0  ;;  %v477_v6 = vpop.f32.mrf.mxu1  ;;  %v536_v7 = vadd.f32 %v535_v4, %v506_v3 }
  0xf3   : > { %v478_v8 = vadd.f32 %v477_v6, %v448_v5 }
  0xf4   : > { %v653_v9 = vadd.f32 %v638_v44, %v536_v7 }
  0xf5   : > { %v652_v10 = vadd.f32 %v637_v41, %v478_v8 }
  0xf6   : > { %665 = vst [vmem:[%s1412_s19 + $0x50] sm:$0xff] %v653_v9 }
  0xf7   : > { %664 = vst [vmem:[%s1412_s19 + $0x48] sm:$0xff] %v652_v10 }
  0xfa   : > { %v555_v11 = vpop.f32.mrf.mxu0 }
  0xfb   : > { %v561_v13 = vpop.f32.mrf.mxu2  ;;  %v584_v14 = vpop.f32.mrf.mxu1 }
  0xfc   : > { %v585_v15 = vadd.f32 %v584_v14, %v555_v11  ;;  %v590_v16 = vpop.f32.mrf.mxu3 }
  0xfd   : > { %v591_v17 = vadd.f32 %v590_v16, %v561_v13 }
  0xfe   : > { %v645_v18 = vadd.f32 %v639_v12, %v585_v15 }
  0xff   : > { %v651_v19 = vadd.f32 %v639_v12, %v591_v17 }
 0x100   : > { %657 = vst [vmem:[%s1412_s19 + $0x10] sm:$0xff] %v645_v18 }
 0x101   : > { %663 = vst [vmem:[%s1412_s19 + $0x40] sm:$0xff] %v651_v19 }
 0x102   : > { %v558_v20 = vpop.f32.mrf.mxu0 }
 0x103   : > { %v564_v21 = vpop.f32.mrf.mxu2  ;;  %v587_v22 = vpop.f32.mrf.mxu1 }
 0x104   : > { %v588_v23 = vadd.f32 %v587_v22, %v558_v20  ;;  %v593_v24 = vpop.f32.mrf.mxu3 }
 0x105   : > { %v594_v25 = vadd.f32 %v593_v24, %v564_v21 }
 0x106   : > { %v648_v26 = vadd.f32 %v639_v12, %v588_v23 }
 0x107   : > { %v654_v27 = vadd.f32 %v639_v12, %v594_v25 }
 0x108   : > { %660 = vst [vmem:[%s1412_s19 + $0x28] sm:$0xff] %v648_v26 }
 0x109   : > { %666 = vst [vmem:[%s1412_s19 + $0x58] sm:$0xff] %v654_v27 }
 0x10a   : > { %1066 = shalt.err (!%p1063_p13)
}
 0x10b   : > { %s1133_s26 = smov 384   ;;  %s1134_s30 = smov 768  }
 0x10c   : > { %s1135_s1 = smov 24  }
 0x10d   : > { %871 = dma.vmem_to_hbm [thread:$0]  (%p1238_p0), %s684_s7, 1536, %s686_s8, %s668_s15, %s1133_s26, %s1134_s30, %s1135_s1  }
 0x10e PF: > { %s700_s6 = sand.u32 1, %s1105_s12   ;;  %p885_p4 = pnand %p817_p3, %p1242_p2 }
 0x10f   : > { %s701_s10 = scalar_lea.sflag [#allocation5], %s700_s6 }
 0x110   : > { %p886_p5 = pneg %p885_p4 }
 0x112   : > { %1100 = dma.done.wait (%p886_p5), %s701_s10, 1536  }
 0x113   : > { %1102 = vsyncadd (%p886_p5), %s701_s10, 4294965760  ;;  %s20_s17 = sadd.s32 1, %s1125_s17   ;;  %s1478_s12 = smov %s1109_s13 }
 0x114   : > { %p17_p1 = scmp.ge.s32.totalorder %s20_s17, 4   ;;  %s1479_s13 = smov %s1113_s14 }
 0x115   : > { %s1480_s14 = smov %s1204_s24  ;;  %s1481_s15 = smov %s1121_s16 }
 0x116   : > { %s1482_s16 = smov %s1484_s18  ;;  %19 = sbr.rel (!%p17_p1) target bundleno = 10 (0xa), region = 102 }
 0x11b   :  { %707 = vsyncpa [#allocation4], 1 }
 0x11c   :  { %709 = vsyncpa [#allocation4 + $0x1], 1 }
 0x11d   :  { %710 = vsyncpa [#allocation7], 1 }
 0x11e   :  { %712 = vsyncpa [#allocation7 + $0x1], 1 }
 0x11f   :  { %713 = vsyncpa [#allocation5], 1 }
 0x120   :  { %715 = vsyncpa [#allocation5 + $0x1], 1 }

</bundles_post_ra>
